<compile_context>
chip_gen: v7x
topology: tpu7x:2x2x1
jax: 0.10.0
libtpu: 0.0.40
codegen_flags: <defaults>
</compile_context>

<pallas_src>
import jax
import jax.numpy as jnp
import numpy as np
from jax.experimental import pallas as pl
from jax.experimental.pallas import tpu as pltpu

LANE = 128


def _round_up(x, m):
    return (x + m - 1) // m * m


def _pad2(w, rows, cols):
    return jnp.pad(w, ((0, rows - w.shape[0]), (0, cols - w.shape[1])))


def _pad1(v, n, fill=0.0):
    return jnp.pad(v, (0, n - v.shape[0]), constant_values=fill)


def decoder_kernel(ids_ref, enc_ref, hid_ref, gi_hbm, w_ref, vec_ref,
                   logp_ref, hnew_ref, gie_buf, gi_sem):
    """ids: (B,) int32 in SMEM; enc: (B,S,Hp) VMEM; hid: (B,Hp) VMEM;
       gi_hbm: (V, 3Hp) HBM table of pre-folded embedding-side GRU gates;
       w_ref: (Hp, 8Hp+2Vp) packed [w1e|w1h|whh_r|whh_z|whh_n|wih_c_r|wih_c_z|wih_c_n|wout_c|wout_h];
       vec_ref: (1, 3Hp+Vp) packed [attn1_b|attn2_w|b_hh_n|b_out(-1e30 padded)]."""
    B, S, Hp = enc_ref.shape
    Vp = logp_ref.shape[1]
    G = 3 * Hp

    # ---- kick off the per-token gather of the embedding-side GRU gates (overlaps attention) ----
    for b in range(B):
        pltpu.make_async_copy(
            gi_hbm.at[pl.ds(ids_ref[b], 1)],
            gie_buf.at[pl.ds(b, 1)],
            gi_sem.at[b],
        ).start()

    enc = enc_ref[...]                                  # (B, S, Hp)
    hid = hid_ref[...]                                  # (B, Hp)

    b1 = vec_ref[:, 0:Hp]                               # (1, Hp)  attn1 bias
    w2 = vec_ref[:, Hp:2 * Hp]                          # (1, Hp)  attn2 weight row
    bhn = vec_ref[:, 2 * Hp:3 * Hp]                     # (1, Hp)  b_hh for the n gate
    bout = vec_ref[:, 3 * Hp:3 * Hp + Vp]               # (1, Vp)  output bias (-1e30 in pad)

    # ---- fused hid-side matmul: hid @ [w1h | whh_r | whh_z | whh_n] -> (B, 4Hp) ----
    hid_proj = jnp.dot(hid, w_ref[:, Hp:5 * Hp], preferred_element_type=jnp.float32)
    attn_h = hid_proj[:, :Hp]                           # attention hidden term
    gh = hid_proj[:, Hp:]                               # (B, 3Hp) GRU hidden-side gates

    # ---- Attention: attn2(tanh(attn1(cat(enc, h)))) ----
    enc_flat = enc.reshape(B * S, Hp)                   # pure view: Hp % 128 == 0
    pre = jnp.dot(enc_flat, w_ref[:, 0:Hp], preferred_element_type=jnp.float32)
    pre = pre.reshape(B, S, Hp) + attn_h[:, None, :] + b1[None, :, :]
    a1 = jnp.tanh(pre)
    # attn2 bias is a constant added before softmax -> mathematical no-op, dropped.
    e = jnp.sum(a1 * w2[None, :, :], axis=-1)           # (B, S)
    e_max = jnp.max(e, axis=1, keepdims=True)
    p = jnp.exp(e - e_max)
    s = jnp.sum(p, axis=1, keepdims=True)
    r0 = pl.reciprocal(s, approx=True)                  # EUP slot
    rinv = r0 * (2.0 - s * r0)                          # one Newton step -> f32 accuracy
    alpha = p * rinv                                    # (B, S)
    # context on the MXU (batched matmul, q = 1)
    context = jnp.einsum("bqs,bsh->bqh", alpha[:, None, :], enc,
                         preferred_element_type=jnp.float32)[:, 0, :]   # (B, Hp)

    # ---- fused context-side matmul: context @ [wih_c_r|wih_c_z|wih_c_n|wout_c] ----
    ctx_proj = jnp.dot(context, w_ref[:, 5 * Hp:8 * Hp + Vp],
                       preferred_element_type=jnp.float32)              # (B, 3Hp+Vp)

    # ---- wait on the gathered embedding-side gates (DMAs ran under the attention) ----
    for b in range(B):
        pltpu.make_async_copy(
            gi_hbm.at[pl.ds(ids_ref[b], 1)],
            gie_buf.at[pl.ds(b, 1)],
            gi_sem.at[b],
        ).wait()
    gie = gie_buf[...]                                  # (B, 3Hp)  (b_ih + b_hh[r,z] folded in)

    # ---- GRU cell (n_layers=1, single timestep) ----
    gi = gie + ctx_proj[:, :G]                          # (B, 3Hp)
    r = jax.nn.sigmoid(gi[:, :Hp] + gh[:, :Hp])
    z = jax.nn.sigmoid(gi[:, Hp:2 * Hp] + gh[:, Hp:2 * Hp])
    n = jnp.tanh(gi[:, 2 * Hp:] + r * (gh[:, 2 * Hp:] + bhn))
    h_new = (1.0 - z) * n + z * hid                     # (B, Hp)

    # ---- Output projection + log_softmax (lane-dense Vp output) ----
    logits = (jnp.dot(h_new, w_ref[:, 8 * Hp + Vp:8 * Hp + 2 * Vp],
                      preferred_element_type=jnp.float32)
              + ctx_proj[:, G:] + bout)                 # (B, Vp); padded cols == -1e30
    m = jnp.max(logits, axis=1, keepdims=True)
    lse = m + jnp.log(jnp.sum(jnp.exp(logits - m), axis=1, keepdims=True))
    logp_ref[...] = logits - lse
    hnew_ref[...] = h_new


def prepare_decoder_params(params, param_dtype=jnp.float32):
    """One-time weight preparation: transpose/split/fold biases and pack into lane-aligned slabs."""
    E = params["embed"].shape[1]
    H = params["w_hh"].shape[1]
    V = params["w_out"].shape[0]
    Hp = _round_up(H, LANE)
    Vp = _round_up(V, LANE)

    w1t = params["attn1_w"].T                                   # (2H, H)
    w1e = _pad2(w1t[:H], Hp, Hp)
    w1h = _pad2(w1t[H:], Hp, Hp)

    wih_t = params["w_ih"].T                                    # (E+H, 3H)
    wih_e, wih_c = wih_t[:E], wih_t[E:]
    whh_t = params["w_hh"].T                                    # (H, 3H)

    whh_g = [_pad2(whh_t[:, g * H:(g + 1) * H], Hp, Hp) for g in range(3)]
    wihc_g = [_pad2(wih_c[:, g * H:(g + 1) * H], Hp, Hp) for g in range(3)]

    wout_t = params["w_out"].T                                  # (2H, V)
    wout_h = _pad2(wout_t[:H], Hp, Vp)
    wout_c = _pad2(wout_t[H:], Hp, Vp)

    # Packed weight slab: (Hp, 8Hp + 2Vp), every segment 128-aligned.
    w_big = jnp.concatenate([w1e, w1h] + whh_g + wihc_g + [wout_c, wout_h], axis=1)

    # Embedding-side GRU gates per token, with b_ih (all gates) and b_hh(r,z) folded in;
    # each gate segment padded to Hp columns so in-kernel gate slices are lane-aligned.
    gate_bias = params["b_ih"] + jnp.concatenate(
        [params["b_hh"][:2 * H], jnp.zeros((H,), params["b_hh"].dtype)])
    gi_raw = params["embed"] @ wih_e + gate_bias[None, :]       # (V, 3H)
    gi_table = jnp.concatenate(
        [_pad2(gi_raw[:, g * H:(g + 1) * H], V, Hp) for g in range(3)], axis=1)  # (V, 3Hp)

    # Packed vector slab: (1, 3Hp + Vp) = [attn1_b | attn2_w | b_hh_n | b_out].
    # The padded vocab tail of b_out is -1e30 so the padded logits vanish in log_softmax.
    vec = jnp.concatenate([
        _pad1(params["attn1_b"], Hp),
        _pad1(params["attn2_w"].reshape(H), Hp),
        _pad1(params["b_hh"][2 * H:], Hp),
        _pad1(params["b_out"], Vp, fill=-1e30),
    ]).reshape(1, 3 * Hp + Vp).astype(jnp.float32)

    return {"w_big": w_big.astype(param_dtype),
            "gi_table": gi_table.astype(param_dtype),
            "vec": vec}


def prepare_encoder_outputs(encoder_outputs, param_dtype=jnp.float32):
    """(S,B,H) -> (B,S,Hp) with the hidden dim zero-padded to a lane tile; once per sequence."""
    S, B, H = encoder_outputs.shape
    Hp = _round_up(H, LANE)
    enc = jnp.transpose(encoder_outputs, (1, 0, 2)).astype(param_dtype)
    return jnp.pad(enc, ((0, 0), (0, 0), (0, Hp - H)))


@jax.jit
def decoder_step(input_ids, last_hidden, enc_p, gi_table, w_big, vec):
    """input_ids: (B,) int32; last_hidden: (1,B,H); enc_p: (B,S,Hp) pre-prepared."""
    B = input_ids.shape[0]
    H = last_hidden.shape[-1]
    Hp = enc_p.shape[-1]
    V = gi_table.shape[0]
    Vp = vec.shape[1] - 3 * Hp

    hid = last_hidden[-1]                                        # (B, H)
    hid_p = jnp.pad(hid.astype(jnp.float32), ((0, 0), (0, Hp - H)))

    logp_p, hnew_p = pl.pallas_call(
        decoder_kernel,
        out_shape=(jax.ShapeDtypeStruct((B, Vp), jnp.float32),
                   jax.ShapeDtypeStruct((B, Hp), jnp.float32)),
        in_specs=[
            pl.BlockSpec(memory_space=pltpu.MemorySpace.SMEM),   # input_ids (scalars)
            pl.BlockSpec(memory_space=pltpu.MemorySpace.VMEM),   # enc_p
            pl.BlockSpec(memory_space=pltpu.MemorySpace.VMEM),   # hid_p
            pl.BlockSpec(memory_space=pl.ANY),                   # gi_table stays in HBM
            pl.BlockSpec(memory_space=pltpu.MemorySpace.VMEM),   # w_big
            pl.BlockSpec(memory_space=pltpu.MemorySpace.VMEM),   # vec
        ],
        out_specs=(pl.BlockSpec(memory_space=pltpu.MemorySpace.VMEM),
                   pl.BlockSpec(memory_space=pltpu.MemorySpace.VMEM)),
        scratch_shapes=[pltpu.VMEM((B, 3 * Hp), gi_table.dtype),
                        pltpu.SemaphoreType.DMA((B,))],
        compiler_params=pltpu.CompilerParams(vmem_limit_bytes=32 * 1024 * 1024),
    )(input_ids, enc_p, hid_p, gi_table, w_big, vec)

    return logp_p[:, :V], hnew_p[None, :, :H]                    # ((B,V), (1,B,H))


def decoder_reference(input_ids, last_hidden, encoder_outputs, params):
    """Pure-JAX replica of the PyTorch forward (eval mode), for validation."""
    H = params["w_hh"].shape[1]
    S, B, _ = encoder_outputs.shape

    embedded = params["embed"][input_ids][None]               # (1, B, E)
    hidden = last_hidden[-1]                                  # (B, H)

    # Attention
    h = jnp.broadcast_to(hidden[None], (S, B, H)).transpose(1, 0, 2)    # (B, S, H)
    enc = encoder_outputs.transpose(1, 0, 2)                            # (B, S, H)
    inputs = jnp.concatenate([enc, h], axis=2).reshape(-1, 2 * H)
    o = jnp.tanh(inputs @ params["attn1_w"].T + params["attn1_b"])
    o = o @ params["attn2_w"].T + params["attn2_b"]
    e = o.reshape(B, S)
    alpha = jax.nn.softmax(e, axis=1)
    context = jnp.einsum("bs,bsh->bh", alpha, enc)[:, None, :]          # (B, 1, H)
    context = context.transpose(1, 0, 2)                                # (1, B, H)

    rnn_input = jnp.concatenate([embedded, context], axis=2)[0]         # (B, E+H)
    gi = rnn_input @ params["w_ih"].T + params["b_ih"]
    gh = hidden @ params["w_hh"].T + params["b_hh"]
    r = jax.nn.sigmoid(gi[:, :H] + gh[:, :H])
    z = jax.nn.sigmoid(gi[:, H:2 * H] + gh[:, H:2 * H])
    n = jnp.tanh(gi[:, 2 * H:] + r * gh[:, 2 * H:])
    h_new = (1.0 - z) * n + z * hidden

    out_cat = jnp.concatenate([h_new, context[0]], axis=1)
    logits = out_cat @ params["w_out"].T + params["b_out"]
    logp = jax.nn.log_softmax(logits, axis=1)
    return logp, h_new[None]


if __name__ == "__main__":
    B, S, E, H, V = 2, 8, 16, 32, 64        # batch, seq, embed, hidden, output(vocab)
    key = jax.random.PRNGKey(0)
    ks = jax.random.split(key, 16)
    sc = 0.1

    params = {
        "embed":   jax.random.normal(ks[0], (V, E), jnp.float32) * sc,
        "attn1_w": jax.random.normal(ks[1], (H, 2 * H), jnp.float32) * sc,
        "attn1_b": jax.random.normal(ks[2], (H,), jnp.float32) * sc,
        "attn2_w": jax.random.normal(ks[3], (1, H), jnp.float32) * sc,
        "attn2_b": jax.random.normal(ks[4], (1,), jnp.float32) * sc,
        "w_ih":    jax.random.normal(ks[5], (3 * H, E + H), jnp.float32) * sc,
        "w_hh":    jax.random.normal(ks[6], (3 * H, H), jnp.float32) * sc,
        "b_ih":    jax.random.normal(ks[7], (3 * H,), jnp.float32) * sc,
        "b_hh":    jax.random.normal(ks[8], (3 * H,), jnp.float32) * sc,
        "w_out":   jax.random.normal(ks[9], (V, 2 * H), jnp.float32) * sc,
        "b_out":   jax.random.normal(ks[10], (V,), jnp.float32) * sc,
    }

    input_ids = jax.random.randint(ks[11], (B,), 0, V, dtype=jnp.int32)
    last_hidden = jax.random.normal(ks[12], (1, B, H), jnp.float32) * sc
    encoder_outputs = jax.random.normal(ks[13], (S, B, H), jnp.float32) * sc

    # One-time prep (hoisted out of the per-step decode path).
    # Use param_dtype=jnp.bfloat16 on v6e/v7x for full-rate MXU + half the DMA bytes.
    prepped = prepare_decoder_params(params, param_dtype=jnp.float32)
    enc_p = prepare_encoder_outputs(encoder_outputs, param_dtype=jnp.float32)
    jax.block_until_ready((prepped, enc_p))

    logp, hidden = decoder_step(input_ids, last_hidden, enc_p,
                                prepped["gi_table"], prepped["w_big"], prepped["vec"])
    jax.block_until_ready((logp, hidden))

    ref_logp, ref_hidden = decoder_reference(input_ids, last_hidden, encoder_outputs, params)
    assert logp.shape == (B, V) and hidden.shape == (1, B, H)
    np.testing.assert_allclose(np.asarray(logp), np.asarray(ref_logp), rtol=1e-4, atol=1e-4)
    np.testing.assert_allclose(np.asarray(hidden), np.asarray(ref_hidden), rtol=1e-4, atol=1e-4)

    print("KERNEL_OK")
</pallas_src>

<mosaic_0001>
module attributes {stable_mosaic.version = 11 : i64} {
  func.func @decoder_kernel(%arg0: memref<2xi32, #tpu.memory_space<smem>>, %arg1: memref<2x8x128xf32, #tpu.memory_space<vmem>>, %arg2: memref<2x128xf32, #tpu.memory_space<vmem>>, %arg3: memref<64x384xf32, #tpu.memory_space<any>>, %arg4: memref<128x1280xf32, #tpu.memory_space<vmem>>, %arg5: memref<1x512xf32, #tpu.memory_space<vmem>>, %arg6: memref<2x128xf32, #tpu.memory_space<vmem>>, %arg7: memref<2x128xf32, #tpu.memory_space<vmem>>, %arg8: memref<2x384xf32, #tpu.memory_space<vmem>>, %arg9: memref<2x!tpu.dma_semaphore, #tpu.memory_space<semaphore_mem>>) attributes {dimension_semantics = [], scalar_prefetch = 0 : i64, scratch_operands = 2 : i64, tpu.core_type = #tpu.core_type<tc>} {
    %c0 = arith.constant 0 : index
    %0 = memref.load %arg0[%c0] : memref<2xi32, #tpu.memory_space<smem>>
    %c0_i32 = arith.constant 0 : i32
    %c0_i32_0 = arith.constant 0 : i32
    %1 = tpu.memref_slice %arg3[%0, %c0_i32_0] : memref<64x384xf32, #tpu.memory_space<any>> -> memref<1x384xf32, #tpu.memory_space<any>>
    %c0_i32_1 = arith.constant 0 : i32
    %c0_i32_2 = arith.constant 0 : i32
    %2 = tpu.memref_slice %arg8[%c0_i32_1, %c0_i32_2] : memref<2x384xf32, #tpu.memory_space<vmem>> -> memref<1x384xf32, #tpu.memory_space<vmem>>
    %3 = tpu.memref_slice %arg9[%c0_i32] : memref<2x!tpu.dma_semaphore, #tpu.memory_space<semaphore_mem>> -> memref<1x!tpu.dma_semaphore, #tpu.memory_space<semaphore_mem>>
    %4 = tpu.memref_squeeze %3 : memref<1x!tpu.dma_semaphore, #tpu.memory_space<semaphore_mem>> -> memref<!tpu.dma_semaphore, #tpu.memory_space<semaphore_mem>>
    tpu.enqueue_dma source(%1 : memref<1x384xf32, #tpu.memory_space<any>>) target(%2 : memref<1x384xf32, #tpu.memory_space<vmem>>) target_semaphore(%4 : memref<!tpu.dma_semaphore, #tpu.memory_space<semaphore_mem>>)
    %c1 = arith.constant 1 : index
    %5 = memref.load %arg0[%c1] : memref<2xi32, #tpu.memory_space<smem>>
    %c1_i32 = arith.constant 1 : i32
    %c0_i32_3 = arith.constant 0 : i32
    %6 = tpu.memref_slice %arg3[%5, %c0_i32_3] : memref<64x384xf32, #tpu.memory_space<any>> -> memref<1x384xf32, #tpu.memory_space<any>>
    %c1_i32_4 = arith.constant 1 : i32
    %c0_i32_5 = arith.constant 0 : i32
    %7 = tpu.memref_slice %arg8[%c1_i32_4, %c0_i32_5] : memref<2x384xf32, #tpu.memory_space<vmem>> -> memref<1x384xf32, #tpu.memory_space<vmem>>
    %8 = tpu.memref_slice %arg9[%c1_i32] : memref<2x!tpu.dma_semaphore, #tpu.memory_space<semaphore_mem>> -> memref<1x!tpu.dma_semaphore, #tpu.memory_space<semaphore_mem>>
    %9 = tpu.memref_squeeze %8 : memref<1x!tpu.dma_semaphore, #tpu.memory_space<semaphore_mem>> -> memref<!tpu.dma_semaphore, #tpu.memory_space<semaphore_mem>>
    tpu.enqueue_dma source(%6 : memref<1x384xf32, #tpu.memory_space<any>>) target(%7 : memref<1x384xf32, #tpu.memory_space<vmem>>) target_semaphore(%9 : memref<!tpu.dma_semaphore, #tpu.memory_space<semaphore_mem>>)
    %c0_6 = arith.constant 0 : index
    %c0_7 = arith.constant 0 : index
    %c0_8 = arith.constant 0 : index
    %10 = vector.load %arg1[%c0_6, %c0_7, %c0_8] : memref<2x8x128xf32, #tpu.memory_space<vmem>>, vector<2x8x128xf32>
    %c0_9 = arith.constant 0 : index
    %c0_10 = arith.constant 0 : index
    %11 = vector.load %arg2[%c0_9, %c0_10] : memref<2x128xf32, #tpu.memory_space<vmem>>, vector<2x128xf32>
    %c0_11 = arith.constant 0 : index
    %c0_12 = arith.constant 0 : index
    %12 = vector.load %arg5[%c0_11, %c0_12] : memref<1x512xf32, #tpu.memory_space<vmem>>, vector<1x128xf32>
    %c0_13 = arith.constant 0 : index
    %c128 = arith.constant 128 : index
    %13 = vector.load %arg5[%c0_13, %c128] : memref<1x512xf32, #tpu.memory_space<vmem>>, vector<1x128xf32>
    %c0_14 = arith.constant 0 : index
    %c256 = arith.constant 256 : index
    %14 = vector.load %arg5[%c0_14, %c256] : memref<1x512xf32, #tpu.memory_space<vmem>>, vector<1x128xf32>
    %c0_15 = arith.constant 0 : index
    %c384 = arith.constant 384 : index
    %15 = vector.load %arg5[%c0_15, %c384] : memref<1x512xf32, #tpu.memory_space<vmem>>, vector<1x128xf32>
    %c0_16 = arith.constant 0 : index
    %c128_17 = arith.constant 128 : index
    %16 = vector.load %arg4[%c0_16, %c128_17] : memref<128x1280xf32, #tpu.memory_space<vmem>>, vector<128x512xf32>
    %cst = arith.constant dense<0.000000e+00> : vector<2x512xf32>
    %17 = tpu.matmul %11, %16, %cst {dimension_numbers = #tpu.dot_dimension_numbers<[1], [0], [0], [1], [0, 0, 1, 1], [], []>} : vector<2x128xf32>, vector<128x512xf32>, vector<2x512xf32> -> vector<2x512xf32>
    %18 = vector.extract_strided_slice %17 {offsets = [0, 0], sizes = [2, 128], strides = [1, 1]} : vector<2x512xf32> to vector<2x128xf32>
    %19 = vector.extract_strided_slice %17 {offsets = [0, 128], sizes = [2, 384], strides = [1, 1]} : vector<2x512xf32> to vector<2x384xf32>
    %20 = vector.shape_cast %10 : vector<2x8x128xf32> to vector<16x128xf32>
    %c0_18 = arith.constant 0 : index
    %c0_19 = arith.constant 0 : index
    %21 = vector.load %arg4[%c0_18, %c0_19] : memref<128x1280xf32, #tpu.memory_space<vmem>>, vector<128x128xf32>
    %cst_20 = arith.constant dense<0.000000e+00> : vector<16x128xf32>
    %22 = tpu.matmul %20, %21, %cst_20 {dimension_numbers = #tpu.dot_dimension_numbers<[1], [0], [0], [1], [0, 0, 1, 1], [], []>} : vector<16x128xf32>, vector<128x128xf32>, vector<16x128xf32> -> vector<16x128xf32>
    %23 = vector.shape_cast %22 : vector<16x128xf32> to vector<2x8x128xf32>
    %24 = vector.shape_cast %18 : vector<2x128xf32> to vector<2x1x128xf32>
    %25 = vector.broadcast %24 : vector<2x1x128xf32> to vector<2x8x128xf32>
    %26 = arith.addf %23, %25 : vector<2x8x128xf32>
    %27 = vector.shape_cast %12 : vector<1x128xf32> to vector<1x1x128xf32>
    %28 = vector.broadcast %27 : vector<1x1x128xf32> to vector<2x8x128xf32>
    %29 = arith.addf %26, %28 : vector<2x8x128xf32>
    %30 = math.tanh %29 : vector<2x8x128xf32>
    %31 = vector.shape_cast %13 : vector<1x128xf32> to vector<1x1x128xf32>
    %32 = vector.broadcast %31 : vector<1x1x128xf32> to vector<2x8x128xf32>
    %33 = arith.mulf %30, %32 : vector<2x8x128xf32>
    %cst_21 = arith.constant dense<0.000000e+00> : vector<2x8xf32>
    %34 = vector.multi_reduction <add>, %33, %cst_21 [2] : vector<2x8x128xf32> to vector<2x8xf32>
    %cst_22 = arith.constant dense<0xFF800000> : vector<2xf32>
    %35 = vector.multi_reduction <maximumf>, %34, %cst_22 [1] : vector<2x8xf32> to vector<2xf32>
    %36 = vector.shape_cast %35 : vector<2xf32> to vector<2x1xf32>
    %37 = vector.broadcast %36 : vector<2x1xf32> to vector<2x8xf32>
    %38 = arith.subf %34, %37 : vector<2x8xf32>
    %39 = math.exp %38 : vector<2x8xf32>
    %cst_23 = arith.constant dense<0.000000e+00> : vector<2xf32>
    %40 = vector.multi_reduction <add>, %39, %cst_23 [1] : vector<2x8xf32> to vector<2xf32>
    %41 = vector.shape_cast %40 : vector<2xf32> to vector<2x1xf32>
    %42 = tpu.reciprocal %41 {approx = true} : vector<2x1xf32> -> vector<2x1xf32>
    %43 = arith.mulf %41, %42 : vector<2x1xf32>
    %cst_24 = arith.constant 2.000000e+00 : f32
    %44 = vector.broadcast %cst_24 : f32 to vector<2x1xf32>
    %45 = arith.subf %44, %43 : vector<2x1xf32>
    %46 = arith.mulf %42, %45 : vector<2x1xf32>
    %47 = vector.broadcast %46 : vector<2x1xf32> to vector<2x8xf32>
    %48 = arith.mulf %39, %47 : vector<2x8xf32>
    %49 = vector.shape_cast %48 : vector<2x8xf32> to vector<2x1x8xf32>
    "tpu.trace_start"() <{level = 10 : i32, message = "bqs,bsh->bqh"}> : () -> ()
    %cst_25 = arith.constant dense<0.000000e+00> : vector<2x1x128xf32>
    %50 = tpu.matmul %49, %10, %cst_25 {dimension_numbers = #tpu.dot_dimension_numbers<[2], [1], [1], [2], [0, 0, 0, 1, 1, 2], [0], [0]>} : vector<2x1x8xf32>, vector<2x8x128xf32>, vector<2x1x128xf32> -> vector<2x1x128xf32>
    "tpu.trace_stop"() : () -> ()
    %51 = vector.shape_cast %50 : vector<2x1x128xf32> to vector<2x128xf32>
    %c0_26 = arith.constant 0 : index
    %c640 = arith.constant 640 : index
    %52 = vector.load %arg4[%c0_26, %c640] : memref<128x1280xf32, #tpu.memory_space<vmem>>, vector<128x512xf32>
    %cst_27 = arith.constant dense<0.000000e+00> : vector<2x512xf32>
    %53 = tpu.matmul %51, %52, %cst_27 {dimension_numbers = #tpu.dot_dimension_numbers<[1], [0], [0], [1], [0, 0, 1, 1], [], []>} : vector<2x128xf32>, vector<128x512xf32>, vector<2x512xf32> -> vector<2x512xf32>
    %c0_28 = arith.constant 0 : index
    %54 = memref.load %arg0[%c0_28] : memref<2xi32, #tpu.memory_space<smem>>
    %c0_i32_29 = arith.constant 0 : i32
    %c0_i32_30 = arith.constant 0 : i32
    %55 = tpu.memref_slice %arg3[%54, %c0_i32_30] : memref<64x384xf32, #tpu.memory_space<any>> -> memref<1x384xf32, #tpu.memory_space<any>>
    %c0_i32_31 = arith.constant 0 : i32
    %c0_i32_32 = arith.constant 0 : i32
    %56 = tpu.memref_slice %arg8[%c0_i32_31, %c0_i32_32] : memref<2x384xf32, #tpu.memory_space<vmem>> -> memref<1x384xf32, #tpu.memory_space<vmem>>
    %57 = tpu.memref_slice %arg9[%c0_i32_29] : memref<2x!tpu.dma_semaphore, #tpu.memory_space<semaphore_mem>> -> memref<1x!tpu.dma_semaphore, #tpu.memory_space<semaphore_mem>>
    %58 = tpu.memref_squeeze %57 : memref<1x!tpu.dma_semaphore, #tpu.memory_space<semaphore_mem>> -> memref<!tpu.dma_semaphore, #tpu.memory_space<semaphore_mem>>
    tpu.wait_dma2 semaphore(%58 : memref<!tpu.dma_semaphore, #tpu.memory_space<semaphore_mem>>) src(%55 : memref<1x384xf32, #tpu.memory_space<any>>) dst(%56 : memref<1x384xf32, #tpu.memory_space<vmem>>)
    %c1_33 = arith.constant 1 : index
    %59 = memref.load %arg0[%c1_33] : memref<2xi32, #tpu.memory_space<smem>>
    %c1_i32_34 = arith.constant 1 : i32
    %c0_i32_35 = arith.constant 0 : i32
    %60 = tpu.memref_slice %arg3[%59, %c0_i32_35] : memref<64x384xf32, #tpu.memory_space<any>> -> memref<1x384xf32, #tpu.memory_space<any>>
    %c1_i32_36 = arith.constant 1 : i32
    %c0_i32_37 = arith.constant 0 : i32
    %61 = tpu.memref_slice %arg8[%c1_i32_36, %c0_i32_37] : memref<2x384xf32, #tpu.memory_space<vmem>> -> memref<1x384xf32, #tpu.memory_space<vmem>>
    %62 = tpu.memref_slice %arg9[%c1_i32_34] : memref<2x!tpu.dma_semaphore, #tpu.memory_space<semaphore_mem>> -> memref<1x!tpu.dma_semaphore, #tpu.memory_space<semaphore_mem>>
    %63 = tpu.memref_squeeze %62 : memref<1x!tpu.dma_semaphore, #tpu.memory_space<semaphore_mem>> -> memref<!tpu.dma_semaphore, #tpu.memory_space<semaphore_mem>>
    tpu.wait_dma2 semaphore(%63 : memref<!tpu.dma_semaphore, #tpu.memory_space<semaphore_mem>>) src(%60 : memref<1x384xf32, #tpu.memory_space<any>>) dst(%61 : memref<1x384xf32, #tpu.memory_space<vmem>>)
    %c0_38 = arith.constant 0 : index
    %c0_39 = arith.constant 0 : index
    %64 = vector.load %arg8[%c0_38, %c0_39] : memref<2x384xf32, #tpu.memory_space<vmem>>, vector<2x384xf32>
    %65 = vector.extract_strided_slice %53 {offsets = [0, 0], sizes = [2, 384], strides = [1, 1]} : vector<2x512xf32> to vector<2x384xf32>
    %66 = arith.addf %64, %65 : vector<2x384xf32>
    %67 = vector.extract_strided_slice %66 {offsets = [0, 0], sizes = [2, 128], strides = [1, 1]} : vector<2x384xf32> to vector<2x128xf32>
    %68 = vector.extract_strided_slice %19 {offsets = [0, 0], sizes = [2, 128], strides = [1, 1]} : vector<2x384xf32> to vector<2x128xf32>
    %69 = arith.addf %67, %68 : vector<2x128xf32>
    %70 = arith.negf %69 : vector<2x128xf32>
    %71 = math.exp %70 : vector<2x128xf32>
    %cst_40 = arith.constant 1.000000e+00 : f32
    %72 = vector.broadcast %cst_40 : f32 to vector<2x128xf32>
    %73 = arith.addf %72, %71 : vector<2x128xf32>
    %74 = arith.divf %72, %73 : vector<2x128xf32>
    %75 = vector.extract_strided_slice %66 {offsets = [0, 128], sizes = [2, 128], strides = [1, 1]} : vector<2x384xf32> to vector<2x128xf32>
    %76 = vector.extract_strided_slice %19 {offsets = [0, 128], sizes = [2, 128], strides = [1, 1]} : vector<2x384xf32> to vector<2x128xf32>
    %77 = arith.addf %75, %76 : vector<2x128xf32>
    %78 = arith.negf %77 : vector<2x128xf32>
    %79 = math.exp %78 : vector<2x128xf32>
    %cst_41 = arith.constant 1.000000e+00 : f32
    %80 = vector.broadcast %cst_41 : f32 to vector<2x128xf32>
    %81 = arith.addf %80, %79 : vector<2x128xf32>
    %82 = arith.divf %80, %81 : vector<2x128xf32>
    %83 = vector.extract_strided_slice %66 {offsets = [0, 256], sizes = [2, 128], strides = [1, 1]} : vector<2x384xf32> to vector<2x128xf32>
    %84 = vector.extract_strided_slice %19 {offsets = [0, 256], sizes = [2, 128], strides = [1, 1]} : vector<2x384xf32> to vector<2x128xf32>
    %85 = vector.broadcast %14 : vector<1x128xf32> to vector<2x128xf32>
    %86 = arith.addf %84, %85 : vector<2x128xf32>
    %87 = arith.mulf %74, %86 : vector<2x128xf32>
    %88 = arith.addf %83, %87 : vector<2x128xf32>
    %89 = math.tanh %88 : vector<2x128xf32>
    %cst_42 = arith.constant 1.000000e+00 : f32
    %90 = vector.broadcast %cst_42 : f32 to vector<2x128xf32>
    %91 = arith.subf %90, %82 : vector<2x128xf32>
    %92 = arith.mulf %91, %89 : vector<2x128xf32>
    %93 = arith.mulf %82, %11 : vector<2x128xf32>
    %94 = arith.addf %92, %93 : vector<2x128xf32>
    %c0_43 = arith.constant 0 : index
    %c1152 = arith.constant 1152 : index
    %95 = vector.load %arg4[%c0_43, %c1152] : memref<128x1280xf32, #tpu.memory_space<vmem>>, vector<128x128xf32>
    %cst_44 = arith.constant dense<0.000000e+00> : vector<2x128xf32>
    %96 = tpu.matmul %94, %95, %cst_44 {dimension_numbers = #tpu.dot_dimension_numbers<[1], [0], [0], [1], [0, 0, 1, 1], [], []>} : vector<2x128xf32>, vector<128x128xf32>, vector<2x128xf32> -> vector<2x128xf32>
    %97 = vector.extract_strided_slice %53 {offsets = [0, 384], sizes = [2, 128], strides = [1, 1]} : vector<2x512xf32> to vector<2x128xf32>
    %98 = arith.addf %96, %97 : vector<2x128xf32>
    %99 = vector.broadcast %15 : vector<1x128xf32> to vector<2x128xf32>
    %100 = arith.addf %98, %99 : vector<2x128xf32>
    %cst_45 = arith.constant dense<0xFF800000> : vector<2xf32>
    %101 = vector.multi_reduction <maximumf>, %100, %cst_45 [1] : vector<2x128xf32> to vector<2xf32>
    %102 = vector.shape_cast %101 : vector<2xf32> to vector<2x1xf32>
    %103 = vector.broadcast %102 : vector<2x1xf32> to vector<2x128xf32>
    %104 = arith.subf %100, %103 : vector<2x128xf32>
    %105 = math.exp %104 : vector<2x128xf32>
    %cst_46 = arith.constant dense<0.000000e+00> : vector<2xf32>
    %106 = vector.multi_reduction <add>, %105, %cst_46 [1] : vector<2x128xf32> to vector<2xf32>
    %107 = vector.shape_cast %106 : vector<2xf32> to vector<2x1xf32>
    %108 = math.log %107 : vector<2x1xf32>
    %109 = arith.addf %102, %108 : vector<2x1xf32>
    %110 = vector.broadcast %109 : vector<2x1xf32> to vector<2x128xf32>
    %111 = arith.subf %100, %110 : vector<2x128xf32>
    %c0_47 = arith.constant 0 : index
    %c0_48 = arith.constant 0 : index
    %112 = vector.load %arg6[%c0_47, %c0_48] : memref<2x128xf32, #tpu.memory_space<vmem>>, vector<2x128xf32>
    tpu.vector_store %arg6[%c0_47, %c0_48], %111 {strides = array<i32>} : memref<2x128xf32, #tpu.memory_space<vmem>>, vector<2x128xf32>,
    %c0_49 = arith.constant 0 : index
    %c0_50 = arith.constant 0 : index
    %113 = vector.load %arg7[%c0_49, %c0_50] : memref<2x128xf32, #tpu.memory_space<vmem>>, vector<2x128xf32>
    tpu.vector_store %arg7[%c0_49, %c0_50], %94 {strides = array<i32>} : memref<2x128xf32, #tpu.memory_space<vmem>>, vector<2x128xf32>,
    return
  }
}

</mosaic_0001>

<bundles_post_ra>
// kernel: decoder_step.1
= control target key start
LH: loop header
LB: loop body
LE: loop exit
PB: predicated region body
PF: predicated region fallthrough
CT: control target
= control target key end

     0   :  { %13 = vsyncpa [#allocation7], 0  ;;  %s1801_s0 = inlined_call_operand.hbm [shape: s32[2], index: 0, kind: input, shape index: {}]   ;;  %s1802_s1 = inlined_call_operand.vmem [shape: f32[2,8,128], index: 1, kind: input, shape index: {}]   ;;  %s1803_s2 = inlined_call_operand.vmem [shape: f32[2,128], index: 2, kind: input, shape index: {}]   ;;  %s1804_s3 = inlined_call_operand.hbm [shape: f32[64,384], index: 3, kind: input, shape index: {}]   ;;  %s1805_s4 = inlined_call_operand.hbm [shape: f32[128,1280], index: 4, kind: input, shape index: {}]   ;;  %s1806_s5 = inlined_call_operand.vmem [shape: f32[1,512], index: 5, kind: input, shape index: {}]   ;;  %s1807_s6 = inlined_call_operand.hbm [shape: f32[2,128], index: 6, kind: output, shape index: {0}]   ;;  %s1808_s7 = inlined_call_operand.vmem [shape: f32[2,128], index: 7, kind: output, shape index: {1}]  }
   0x1   :  { %14 = vsyncpa [#allocation5], 0 }
   0x2   :  { %15 = vsyncpa [#allocation6], 0  ;;  %s1452_s26 = scalar_lea.hbm %s1801_s0, 16 }
   0x3   :  { %p1453_p0 = scmp.ne.s32.totalorder %s1801_s0, %s1452_s26  ;;  %p1456_p1 = scmp.lt.u32.totalorder %s1452_s26, %s1801_s0 }
   0x5   :  { %p1458_p2 = pnand %p1456_p1, %p1453_p0 }
   0x7   :  { %1461 = shalt.err (!%p1458_p2)
}
   0x8   :  { %s1564_s8 = smov [#allocation4]   ;;  %s1565_s11 = smov [#allocation8]  }
   0x9   :  { %23 = dma.hbm_to_smem %s1801_s0, 16, %s1564_s8, [#allocation7]  }
   0xa   :  { %s33_s12 = sshll.u32 %s1565_s11, 4  ;;  %s1462_s15 = scalar_lea.hbm %s1805_s4, 20480  ;;  %s34_s12 = int_to_ptr.vmem [resolvable:$true] %s33_s12 }
   0xb   :  { %p1463_p3 = scmp.ne.s32.totalorder %s1805_s4, %s1462_s15  ;;  %p1466_p4 = scmp.lt.u32.totalorder %s1462_s15, %s1805_s4 }
   0xd   :  { %p1468_p5 = pnand %p1466_p4, %p1463_p3 }
   0xf   :  { %1471 = shalt.err (!%p1468_p5)
}
  0x10   :  { %s1472_s20 = scalar_lea.vmem %s34_s12, 20480  ;;  %p1477_p7 = scmp.lt.s32.totalorder %s34_s12, %s34_s12 }
  0x11   :  { %p1473_p6 = scmp.ne.s32.totalorder %s34_s12, %s1472_s20  ;;  %p1478_p8 = scmp.lt.s32.totalorder %s1472_s20, %s1472_s20 }
  0x13   :  { %p1479_p9 = por %p1478_p8, %p1477_p7 }
  0x15   :  { %p1480_p10 = pnand %p1479_p9, %p1473_p6 }
  0x17   :  { %1483 = shalt.err (!%p1480_p10)
}
  0x18   :  { %s1566_s0 = smov 1280   ;;  %s1567_s21 = smov 80  }
  0x19   :  { %39 = dma.hbm_to_vmem [thread:$0]  %s1805_s4, 20480, %s34_s12, [#allocation5], %s1566_s0, %s1566_s0, %s1567_s21  }
  0x1a   :  { %1554 = dma.done.wait [#allocation7], 16  }
  0x1b   :  { %1555 = vsyncadd [#allocation7], 4294967280 }
  0x1c   :  { %1556 = dma.done.wait [#allocation5], 20480  }
  0x1d   :  { %1557 = vsyncadd [#allocation5], 4294946816 }
  0x1e   :  { %48 = sfence }
  0x1f   :  { %v1647_v0 = vld [vmem:[%s1806_s5 + $0x2] ss:$0 sm:$0xff]  ;;  %v1652_v1 = vld [vmem:[%s1806_s5 + $0x3] ss:$0 sm:$0xff]  ;;  %v83_v2 = vld [vmem:[#allocation8 + $0x10] sm:$0xff]  ;;  %v1568_v6 = vmov 0.0  }
  0x20   :  { %v87_v3 = vld [vmem:[#allocation8 + $0x60] sm:$0xff]  ;;  %v82_v4 = vld [vmem:[#allocation8 + $0x8] sm:$0xff]  ;;  %v86_v5 = vld [vmem:[#allocation8 + $0x58] sm:$0xff]  ;;  %210 = vmatprep.mubr.f32.mxu0 %v1568_v6  ;;  %281 = vmatprep.mubr.f32.mxu1 %v1568_v6  ;;  %vm448_vm0 = vcmask 1041409   ;;  %vm451_vm1 = vcmask 58368   ;;  %vm1571_vm2 = vmmov 0  }
  0x21   :  { %v1226_v7 = vpack.c.bf16 %v87_v3, %v83_v2  ;;  %v1228_v8 = vpack.c.bf16 %v86_v5, %v82_v4  ;;  %v91_v9 = vld [vmem:[#allocation8 + $0xb0] sm:$0xff]  ;;  %v95_v10 = vld [vmem:[#allocation8 + $0x100] sm:$0xff]  ;;  %v90_v11 = vld [vmem:[#allocation8 + $0xa8] sm:$0xff]  ;;  %vm518_vm3 = vcmask 64512   ;;  %s1572_s12 = smov [#allocation2]   ;;  %s1486_s24 = scalar_lea.hbm %s1804_s3, 3072 }
  0x22   :  { %v1230_v12 = vpack.c.bf16 %v95_v10, %v91_v9  ;;  %v94_v13 = vld [vmem:[#allocation8 + $0xf8] sm:$0xff]  ;;  %v99_v14 = vld [vmem:[#allocation8 + $0x150] sm:$0xff]  ;;  %v103_v15 = vld [vmem:[#allocation8 + $0x1a0] sm:$0xff]  ;;  %s57_s13 = sshll.u32 %s1572_s12, 4  ;;  %s1731_s13 = int_to_ptr.vmem [resolvable:$true] %s57_s13 }
  0x23   :  { %1227 = vmatprep.subr.bf16.mxu0 %v1226_v7  ;;  %v1232_v16 = vpack.c.bf16 %v94_v13, %v90_v11  ;;  %v1234_v17 = vpack.c.bf16 %v103_v15, %v99_v14  ;;  %v98_v18 = vld [vmem:[#allocation8 + $0x148] sm:$0xff]  ;;  %v102_v19 = vld [vmem:[#allocation8 + $0x198] sm:$0xff]  ;;  %v107_v20 = vld [vmem:[#allocation8 + $0x1f0] sm:$0xff] }
  0x24   :  { %1229 = vmatpush1.bf16.msra.mxu0 %v1228_v8  ;;  %v111_v21 = vld [vmem:[#allocation8 + $0x240] sm:$0xff]  ;;  %v1236_v22 = vpack.c.bf16 %v102_v19, %v98_v18  ;;  %v106_v24 = vld [vmem:[#allocation8 + $0x1e8] sm:$0xff]  ;;  %v110_v25 = vld [vmem:[#allocation8 + $0x238] sm:$0xff]  ;;  %v1569_v19 = vmov 1966171168  }
  0x25   :  { %1231 = vmatprep.subr.bf16.mxu0 %v1230_v12  ;;  %v1238_v23 = vpack.c.bf16 %v111_v21, %v107_v20  ;;  %v115_v26 = vld [vmem:[#allocation8 + $0x290] sm:$0xff]  ;;  %v119_v27 = vld [vmem:[#allocation8 + $0x2e0] sm:$0xff]  ;;  %v1240_v28 = vpack.c.bf16 %v110_v25, %v106_v24  ;;  %v114_v30 = vld [vmem:[#allocation8 + $0x288] sm:$0xff]  ;;  %v381_v20 = vunpack.c.l.s4 %v1569_v19  ;;  %v383_v21 = vlaneseq }
  0x26   :  { %v1242_v29 = vpack.c.bf16 %v119_v27, %v115_v26  ;;  %v118_v31 = vld [vmem:[#allocation8 + $0x2d8] sm:$0xff]  ;;  %v123_v32 = vld [vmem:[#allocation8 + $0x330] sm:$0xff]  ;;  %v127_v33 = vld [vmem:[#allocation8 + $0x380] sm:$0xff] }
  0x27   :  { %v1244_v34 = vpack.c.bf16 %v118_v31, %v114_v30  ;;  %v1246_v35 = vpack.c.bf16 %v127_v33, %v123_v32  ;;  %v122_v36 = vld [vmem:[#allocation8 + $0x328] sm:$0xff]  ;;  %v126_v37 = vld [vmem:[#allocation8 + $0x378] sm:$0xff]  ;;  %v131_v38 = vld [vmem:[#allocation8 + $0x3d0] sm:$0xff] }
  0x28   :  { %1233 = vmatpush1.bf16.msra.mxu0 %v1232_v16  ;;  %v135_v39 = vld [vmem:[#allocation8 + $0x420] sm:$0xff]  ;;  %v1248_v40 = vpack.c.bf16 %v126_v37, %v122_v36  ;;  %v130_v42 = vld [vmem:[#allocation8 + $0x3c8] sm:$0xff]  ;;  %v134_v43 = vld [vmem:[#allocation8 + $0x418] sm:$0xff] }
  0x29   :  { %1235 = vmatprep.subr.bf16.mxu0 %v1234_v17  ;;  %v1250_v41 = vpack.c.bf16 %v135_v39, %v131_v38  ;;  %v139_v44 = vld [vmem:[#allocation8 + $0x470] sm:$0xff]  ;;  %v143_v45 = vld [vmem:[#allocation8 + $0x4c0] sm:$0xff]  ;;  %v1252_v46 = vpack.c.bf16 %v134_v43, %v130_v42  ;;  %v138_v48 = vld [vmem:[#allocation8 + $0x468] sm:$0xff] }
  0x2a   :  { %v1254_v47 = vpack.c.bf16 %v143_v45, %v139_v44  ;;  %v142_v49 = vld [vmem:[#allocation8 + $0x4b8] sm:$0xff]  ;;  %v288_v50 = vld [vmem:[#allocation8] sm:$0xff]  ;;  %v289_v51 = vld [vmem:[#allocation8 + $0x50] sm:$0xff]  ;;  %v439_v44 = vand.u32 127, %v383_v21 }
  0x2b   :  { %v1256_v52 = vpack.c.bf16 %v142_v49, %v138_v48  ;;  %v1290_v53 = vpack.c.bf16 %v289_v51, %v288_v50  ;;  %v290_v54 = vld [vmem:[#allocation8 + $0xa0] sm:$0xff]  ;;  %v291_v55 = vld [vmem:[#allocation8 + $0xf0] sm:$0xff]  ;;  %v1659_v56 = vld [vmem:[%s1803_s2] sm:$0x3] }
  0x2c   :  { %1237 = vmatpush1.bf16.msra.mxu0 %v1236_v22  ;;  %v1294_v57 = vpack.c.bf16 %v291_v55, %v290_v54  ;;  %v75_v58 = vld [vmem:[%s1802_s1] sm:$0xff]  ;;  %v293_v60 = vld [vmem:[#allocation8 + $0x190] sm:$0xff]  ;;  %v1668_v16 = vld [vmem:[%s1802_s1 + $0x8] sm:$0xff]  ;;  %v382_v22 = vunpack.c.0.s8 %v381_v20 }
  0x2d   :  { %1239 = vmatprep.subr.bf16.mxu0 %v1238_v23  ;;  %v292_v59 = vld [vmem:[#allocation8 + $0x140] sm:$0xff]  ;;  %v295_v63 = vld [vmem:[#allocation8 + $0x230] sm:$0xff]  ;;  %v1674_v23 = vshrl.u32 %v383_v21, 7  ;;  %v1097_v33 = vld [vmem:[%s1806_s5] ss:$0 sm:$0xff] }
  0x2e   :  { %v1298_v61 = vpack.c.bf16 %v293_v60, %v292_v59  ;;  %v294_v62 = vld [vmem:[#allocation8 + $0x1e0] sm:$0xff]  ;;  %v297_v4 = vld [vmem:[#allocation8 + $0x2d0] sm:$0xff]  ;;  %v1098_v39 = vld [vmem:[%s1806_s5 + $0x1] ss:$0 sm:$0xff]  ;;  %s49_s5 = sld [smem:[#allocation4]] }
  0x2f   :  { %v1302_v2 = vpack.c.bf16 %v295_v63, %v294_v62  ;;  %v296_v3 = vld [vmem:[#allocation8 + $0x280] sm:$0xff]  ;;  %v299_v8 = vld [vmem:[#allocation8 + $0x370] sm:$0xff]  ;;  %v385_v24 = vsub.s32 %v382_v22, %v1674_v23  ;;  %v92_v20 = vld [vmem:[#allocation8 + $0xb8] sm:$0xff] }
  0x30   :  { %1241 = vmatpush1.bf16.msra.mxu0 %v1240_v28  ;;  %v1306_v5 = vpack.c.bf16 %v297_v4, %v296_v3  ;;  %v298_v7 = vld [vmem:[#allocation8 + $0x320] sm:$0xff]  ;;  %v301_v11 = vld [vmem:[#allocation8 + $0x410] sm:$0xff]  ;;  %v96_v21 = vld [vmem:[#allocation8 + $0x108] sm:$0xff] }
  0x31   :  { %1243 = vmatprep.subr.bf16.mxu0 %v1242_v29  ;;  %v1310_v9 = vpack.c.bf16 %v299_v8, %v298_v7  ;;  %v300_v10 = vld [vmem:[#allocation8 + $0x3c0] sm:$0xff]  ;;  %v303_v14 = vld [vmem:[#allocation8 + $0x4b0] sm:$0xff]  ;;  %v1678_v29 = vsub.s32 0, %v1674_v23 }
  0x32   :  { %v1314_v12 = vpack.c.bf16 %v301_v11, %v300_v10  ;;  %v302_v13 = vld [vmem:[#allocation8 + $0x460] sm:$0xff]  ;;  %v89_v10 = vld [vmem:[#allocation8 + $0x70] sm:$0xff]  ;;  %v84_v11 = vld [vmem:[#allocation8 + $0x18] sm:$0xff] }
  0x33   :  { %v1318_v15 = vpack.c.bf16 %v303_v14, %v302_v13  ;;  %v88_v13 = vld [vmem:[#allocation8 + $0x68] sm:$0xff]  ;;  %v93_v14 = vld [vmem:[#allocation8 + $0xc0] sm:$0xff] }
  0x34   :  { %1245 = vmatpush1.bf16.msra.mxu0 %v1244_v34  ;;  %v101_v22 = vld [vmem:[#allocation8 + $0x160] sm:$0xff]  ;;  %s50_s14 = sshrl.u32 %s49_s5, 3  ;;  %s51_s15 = sand.u32 7, %s49_s5  }
  0x35   :  { %1247 = vmatprep.subr.bf16.mxu0 %v1246_v35  ;;  %s52_s16 = smul.u32 24, %s50_s14 }
  0x37   :  { %s53_s17 = sadd.s32 %s52_s16, %s51_s15 }
  0x38   :  { %1249 = vmatpush1.bf16.msra.mxu0 %v1248_v40  ;;  %s1094_s18 = sshll.u32 %s53_s17, 4 }
  0x39   :  { %1251 = vmatprep.subr.bf16.mxu0 %v1250_v41  ;;  %s55_s0 = scalar_lea.hbm %s1804_s3, %s1094_s18 }
  0x3a   :  { %s1484_s21 = scalar_lea.hbm %s55_s0, 48  ;;  %p1487_p12 = scmp.lt.u32.totalorder %s55_s0, %s1804_s3 }
  0x3b   :  { %p1485_p11 = scmp.ne.s32.totalorder %s55_s0, %s1484_s21  ;;  %p1488_p13 = scmp.lt.u32.totalorder %s1486_s24, %s1484_s21 }
  0x3c   :  { %1253 = vmatpush1.bf16.msra.mxu0 %v1252_v46  ;;  %v1689_v46 = vsub.s32 %v439_v44, %v1674_v23  ;;  %p1490_p1 = scmp.lt.u32.totalorder %s1484_s21, %s55_s0 }
  0x3d   :  { %1255 = vmatprep.subr.bf16.mxu0 %v1254_v47  ;;  %p1489_p0 = por %p1488_p13, %p1487_p12 }
  0x3f   :  { %p1491_p2 = por %p1490_p1, %p1489_p0 }
  0x40   :  { %1257 = vmatpush1.bf16.msra.mxu0 %v1256_v52  ;;  %v1570_v52 = vmov 0  }
  0x41   :  { %1291 = vmatprep.subr.bf16.mxu0 %v1290_v53  ;;  %1427 = vset.pattern.permute.xlu0 %v1570_v52  ;;  %p1492_p3 = pnand %p1491_p2, %p1485_p11 }
  0x42   :  { %1426 = vset.pattern.permute.xlu1 %v1570_v52 }
  0x43   :  { %211 = vmatmul.mubr.f32.vlgmr.msra.gmra.mrb[0].mxu0 %v1659_v56 }
  0x44   :  { %1293 = vmatpush3.bf16.msra.mxu0 %v1290_v53  ;;  %1178 = vmatprep.mubr.f32.mxu0 %v75_v58  ;;  %v462_v53 = vsub.s32 1, %v1674_v23 }
  0x45   :  { %1295 = vmatprep.subr.bf16.mxu0 %v1294_v57 }
  0x48   :  { %1297 = vmatpush3.bf16.msra.mxu0 %v1294_v57 }
  0x49   :  { %1299 = vmatprep.subr.bf16.mxu0 %v1298_v61 }
  0x4c   :  { %1301 = vmatpush3.bf16.msra.mxu0 %v1298_v61 }
  0x4d   :  { %1303 = vmatprep.subr.bf16.mxu0 %v1302_v2 }
  0x50   :  { %1305 = vmatpush3.bf16.msra.mxu0 %v1302_v2 }
  0x51   :  { %1307 = vmatprep.subr.bf16.mxu0 %v1306_v5 }
  0x54   :  { %1309 = vmatpush3.bf16.msra.mxu0 %v1306_v5 }
  0x55   :  { %1311 = vmatprep.subr.bf16.mxu0 %v1310_v9 }
  0x58   :  { %1313 = vmatpush3.bf16.msra.mxu0 %v1310_v9  ;;  %v85_v9 = vld [vmem:[#allocation8 + $0x20] sm:$0xff] }
  0x59   :  { %1315 = vmatprep.subr.bf16.mxu0 %v1314_v12 }
  0x5c   :  { %1317 = vmatpush3.bf16.msra.mxu0 %v1314_v12  ;;  %v1258_v12 = vpack.c.bf16 %v89_v10, %v85_v9 }
  0x5d   :  { %1319 = vmatprep.subr.bf16.mxu0 %v1318_v15 }
  0x5e   :  { %1259 = vmatprep.subr.bf16.mxu1 %v1258_v12 }
  0x60   :  { %1321 = vmatpush3.bf16.msra.mxu0 %v1318_v15  ;;  %v97_v15 = vld [vmem:[#allocation8 + $0x110] sm:$0xff] }
  0x61   :  { %1181 = vmatprep.subr.mxu0 %v1568_v6  ;;  %v1262_v19 = vpack.c.bf16 %v97_v15, %v93_v14  ;;  %v676_v14 = vld [vmem:[#allocation8 + $0x80] sm:$0xff] }
  0x62   :  { %v674_v15 = vld [vmem:[#allocation8 + $0x40] sm:$0xff] }
  0x63   :  { %1179 = vmatmul.mubr.f32.vlgmr.msra.gmra.mrb[2].mxu0 %v1668_v16 }
  0x64   :  { %1182 = vmatpush3.msra.mxu0 %v75_v58  ;;  %1183 = vmatprep.mubr.msk.f32.mxu0 %vm1571_vm2, %v1568_v6 }
 0x116   :  { %v212_v17 = vpop.f32.mrb[0].mxu0 }
 0x117   :  { %v1672_v18 = vpop.f32.mrb[1].mxu0  ;;  %v386_v25 = vrot.slane %v212_v17, %v385_v24  ;;  %v1260_v17 = vpack.c.bf16 %v88_v13, %v84_v11  ;;  %v672_v13 = vld [vmem:[#allocation8 + $0x30] sm:$0xff] }
 0x119   :  { %v387_v26 = vcombine.high %v386_v25, %v386_v25  ;;  %v394_v28 = vrot.slane %v386_v25, %v385_v24  ;;  %1261 = vmatpush1.bf16.msra.mxu1 %v1260_v17  ;;  %v1264_v25 = vpack.c.bf16 %v96_v21, %v92_v20  ;;  %v1322_v17 = vpack.c.bf16 %v676_v14, %v672_v13  ;;  %v671_v20 = vld [vmem:[#allocation8 + $0x28] sm:$0xff]  ;;  %v675_v21 = vld [vmem:[#allocation8 + $0x78] sm:$0xff]  ;;  %v710_v14 = vld [vmem:[#allocation8 + $0x310] sm:$0xff] }
 0x11a   :  { %1263 = vmatprep.subr.bf16.mxu1 %v1262_v19  ;;  %v707_v13 = vld [vmem:[#allocation8 + $0x2f8] sm:$0xff] }
 0x11b   :  { %v401_v27 = vrot.slane %v387_v26, %v385_v24  ;;  %v405_v32 = vrot.slane %v394_v28, %v1678_v29  ;;  %v105_v24 = vld [vmem:[#allocation8 + $0x1b0] sm:$0xff]  ;;  %v104_v28 = vld [vmem:[#allocation8 + $0x1a8] sm:$0xff] }
 0x11c   :  { %v1266_v26 = vpack.c.bf16 %v105_v24, %v101_v22  ;;  %v680_v22 = vld [vmem:[#allocation8 + $0xd0] sm:$0xff]  ;;  %v684_v24 = vld [vmem:[#allocation8 + $0x120] sm:$0xff] }
 0x11d   :  { %v409_v30 = vrot.slane %v401_v27, %v1678_v29  ;;  %v100_v27 = vld [vmem:[#allocation8 + $0x158] sm:$0xff]  ;;  %1265 = vmatpush1.bf16.msra.mxu1 %v1264_v25 }
 0x11e   :  { %1267 = vmatprep.subr.bf16.mxu1 %v1266_v26  ;;  %v673_v26 = vld [vmem:[#allocation8 + $0x38] sm:$0xff] }
 0x136   :  { %v1180_v31 = vpop.f32.mrb[2].mxu0 }
 0x137   :  { %v413_v34 = vadd.f32 %v1180_v31, %v409_v30  ;;  %v370_v35 = vpop.f32.mrb[3].mxu0  ;;  %v109_v30 = vld [vmem:[#allocation8 + $0x200] sm:$0xff]  ;;  %v113_v31 = vld [vmem:[#allocation8 + $0x250] sm:$0xff] }
 0x138   :  { %v412_v36 = vadd.f32 %v405_v32, %v370_v35  ;;  %v1268_v32 = vpack.c.bf16 %v104_v28, %v100_v27  ;;  %v112_v35 = vld [vmem:[#allocation8 + $0x248] sm:$0xff] }
 0x139   :  { %v421_v37 = vadd.f32 %v1097_v33, %v413_v34  ;;  %v108_v34 = vld [vmem:[#allocation8 + $0x1f8] sm:$0xff]  ;;  %v677_v27 = vld [vmem:[#allocation8 + $0x88] sm:$0xff] }
 0x13a   :  { %v420_v38 = vadd.f32 %v1097_v33, %v412_v36  ;;  %v1270_v33 = vpack.c.bf16 %v113_v31, %v109_v30  ;;  %v117_v36 = vld [vmem:[#allocation8 + $0x2a0] sm:$0xff]  ;;  %1269 = vmatpush1.bf16.msra.mxu1 %v1268_v32  ;;  %v1326_v30 = vpack.c.bf16 %v684_v24, %v680_v22  ;;  %v679_v32 = vld [vmem:[#allocation8 + $0xc8] sm:$0xff] }
 0x13b   :  { %v682_v31 = vld [vmem:[#allocation8 + $0xe0] sm:$0xff] }
 0x13c   :  { %1428 = vtanh.f32 %v420_v38  ;;  %v1272_v38 = vpack.c.bf16 %v112_v35, %v108_v34  ;;  %1271 = vmatprep.subr.bf16.mxu1 %v1270_v33  ;;  %v683_v33 = vld [vmem:[#allocation8 + $0x118] sm:$0xff]  ;;  %v686_v34 = vld [vmem:[#allocation8 + $0x130] sm:$0xff] }
 0x13d   :  { %1430 = vtanh.f32 %v421_v37  ;;  %v121_v37 = vld [vmem:[#allocation8 + $0x2f0] sm:$0xff] }
 0x13e   :  { %1273 = vmatpush1.bf16.msra.mxu1 %v1272_v38  ;;  %v688_v35 = vld [vmem:[#allocation8 + $0x170] sm:$0xff]  ;;  %v1356_v38 = vpack.c.bf16 %v677_v27, %v673_v26  ;;  %v715_v26 = vld [vmem:[#allocation8 + $0x398] sm:$0xff] }
 0x13f   :  { %v718_v27 = vld [vmem:[#allocation8 + $0x3b0] sm:$0xff] }
 0x146   :  { %v1429_v40 = vpop.eup %1428 }
 0x147   :  { %v430_v41 = vmul.f32 %v1429_v40, %v1098_v39  ;;  %v1431_v42 = vpop.eup %1430  ;;  %v116_v40 = vld [vmem:[#allocation8 + $0x298] sm:$0xff] }
 0x148   :  { %v431_v43 = vmul.f32 %v1431_v42, %v1098_v39  ;;  %v1274_v39 = vpack.c.bf16 %v121_v37, %v117_v36  ;;  %v125_v42 = vld [vmem:[#allocation8 + $0x340] sm:$0xff] }
 0x149   :  { %432 = vadd.xlane.f32.xlu0 %v430_v41  ;;  %v120_v41 = vld [vmem:[#allocation8 + $0x2e8] sm:$0xff]  ;;  %v692_v36 = vld [vmem:[#allocation8 + $0x1c0] sm:$0xff] }
 0x14a   :  { %v1276_v44 = vpack.c.bf16 %v120_v41, %v116_v40  ;;  %1275 = vmatprep.subr.bf16.mxu1 %v1274_v39  ;;  %v1328_v39 = vpack.c.bf16 %v683_v33, %v679_v32  ;;  %v681_v40 = vld [vmem:[#allocation8 + $0xd8] sm:$0xff]  ;;  %v685_v41 = vld [vmem:[#allocation8 + $0x128] sm:$0xff] }
 0x14b   :  { %v713_v33 = vld [vmem:[#allocation8 + $0x358] sm:$0xff] }
 0x14c   :  { %1277 = vmatpush1.bf16.msra.mxu1 %v1276_v44  ;;  %v1330_v44 = vpack.c.bf16 %v692_v36, %v688_v35  ;;  %v717_v35 = vld [vmem:[#allocation8 + $0x3a8] sm:$0xff] }
 0x14d   :  { %434 = vadd.xlane.f32.xlu0 %v431_v43  ;;  %v129_v43 = vld [vmem:[#allocation8 + $0x390] sm:$0xff] }
 0x1d6   :  { %v433_v45 = vpop.xlane.xlu0 %432 }
 0x1d7   :  { %v443_v48 = vrot.slane %v433_v45, %v1689_v46 }
 0x1da   :  { %v435_v47 = vpop.xlane.xlu0 %434 }
 0x1db   :  { %v447_v49 = vrot.slane %v435_v47, %v1689_v46 }
 0x1dd   :  { %v449_v50 = vsel %vm448_vm0, %v447_v49, %v443_v48  ;;  %v128_v48 = vld [vmem:[#allocation8 + $0x388] sm:$0xff]  ;;  %v133_v49 = vld [vmem:[#allocation8 + $0x3e0] sm:$0xff] }
 0x1de   :  { %v452_v51 = vsel %vm451_vm1, %v449_v50, -inf  ;;  %v137_v50 = vld [vmem:[#allocation8 + $0x430] sm:$0xff] }
 0x1df   :  { %453 = vmax.xlane.f32.xlu1 %v452_v51  ;;  %v1282_v52 = vpack.c.bf16 %v137_v50, %v133_v49  ;;  %v694_v49 = vld [vmem:[#allocation8 + $0x1d0] sm:$0xff] }
 0x1e0   :  { %v696_v50 = vld [vmem:[#allocation8 + $0x210] sm:$0xff] }
 0x26c   :  { %v454_v54 = vpop.xlane.xlu1 %453 }
 0x26d   :  { %v459_v55 = vrot.slane %v454_v54, %v1678_v29  ;;  %v463_v57 = vrot.slane %v454_v54, %v462_v53  ;;  %v132_v54 = vld [vmem:[#allocation8 + $0x3d8] sm:$0xff] }
 0x26f   :  { %v466_v58 = vsub.f32 %v433_v45, %v459_v55  ;;  %v467_v59 = vsub.f32 %v435_v47, %v463_v57  ;;  %v1278_v45 = vpack.c.bf16 %v129_v43, %v125_v42  ;;  %v124_v47 = vld [vmem:[#allocation8 + $0x338] sm:$0xff]  ;;  %v136_v55 = vld [vmem:[#allocation8 + $0x428] sm:$0xff]  ;;  %v141_v57 = vld [vmem:[#allocation8 + $0x480] sm:$0xff]  ;;  %v1358_v43 = vpack.c.bf16 %v686_v34, %v682_v31 }
 0x270   :  { %v1280_v51 = vpack.c.bf16 %v128_v48, %v124_v47  ;;  %v687_v47 = vld [vmem:[#allocation8 + $0x168] sm:$0xff]  ;;  %v691_v48 = vld [vmem:[#allocation8 + $0x1b8] sm:$0xff] }
 0x271   :  { %v468_v60 = vmul.f32 1.442695, %v466_v58  ;;  %v470_v61 = vmul.f32 1.442695, %v467_v59  ;;  %1279 = vmatprep.subr.bf16.mxu1 %v1278_v45  ;;  %v145_v58 = vld [vmem:[#allocation8 + $0x4d0] sm:$0xff]  ;;  %v1284_v59 = vpack.c.bf16 %v136_v55, %v132_v54  ;;  %v690_v45 = vld [vmem:[#allocation8 + $0x180] sm:$0xff]  ;;  %v1332_v54 = vpack.c.bf16 %v691_v48, %v687_v47 }
 0x272   :  { %1281 = vmatpush1.bf16.msra.mxu1 %v1280_v51  ;;  %v700_v51 = vld [vmem:[#allocation8 + $0x260] sm:$0xff]  ;;  %v689_v55 = vld [vmem:[#allocation8 + $0x178] sm:$0xff]  ;;  %v728_v48 = vld [vmem:[#allocation8 + $0x490] sm:$0xff] }
 0x273   :  { %1432 = vpow2.f32 %v468_v60  ;;  %1283 = vmatprep.subr.bf16.mxu1 %v1282_v52  ;;  %v1286_v60 = vpack.c.bf16 %v145_v58, %v141_v57  ;;  %v1360_v52 = vpack.c.bf16 %v685_v41, %v681_v40  ;;  %v693_v57 = vld [vmem:[#allocation8 + $0x1c8] sm:$0xff]  ;;  %v1334_v58 = vpack.c.bf16 %v700_v51, %v696_v50  ;;  %v726_v40 = vld [vmem:[#allocation8 + $0x450] sm:$0xff]  ;;  %v730_v50 = vld [vmem:[#allocation8 + $0x4a0] sm:$0xff] }
 0x274   :  { %1434 = vpow2.f32 %v470_v61  ;;  %v140_v61 = vld [vmem:[#allocation8 + $0x478] sm:$0xff]  ;;  %v1376_v41 = vpack.c.bf16 %v717_v35, %v713_v33 }
 0x276   :  { %1285 = vmatpush1.bf16.msra.mxu1 %v1284_v59  ;;  %v698_v59 = vld [vmem:[#allocation8 + $0x220] sm:$0xff] }
 0x277   :  { %1287 = vmatprep.subr.bf16.mxu1 %v1286_v60  ;;  %v695_v60 = vld [vmem:[#allocation8 + $0x208] sm:$0xff] }
 0x27d   :  { %v1699_v62 = vpop.eup %1432 }
 0x27e   :  { %v1701_v63 = vpop.eup %1434  ;;  %475 = vperm.xlu1 %1426, %v1699_v62  }
 0x27f   :  { %478 = vperm.xlu0 %1427, %v1701_v63  }
 0x2fd   :  { %v476_v2 = vpop.permute.xlu1 %475 }
 0x2fe   :  { %v479_v3 = vpop.permute.xlu0 %478  ;;  %v483_v4 = vrot.slane %v476_v2, %v1689_v46  ;;  %v144_v2 = vld [vmem:[#allocation8 + $0x4c8] sm:$0xff] }
 0x2ff   :  { %v487_v5 = vrot.slane %v479_v3, %v1689_v46  ;;  %v1288_v3 = vpack.c.bf16 %v144_v2, %v140_v61  ;;  %v699_v61 = vld [vmem:[#allocation8 + $0x258] sm:$0xff]  ;;  %v702_v2 = vld [vmem:[#allocation8 + $0x270] sm:$0xff] }
 0x301   :  { %v488_v7 = vsel %vm448_vm0, %v487_v5, %v483_v4  ;;  %1289 = vmatpush1.bf16.msra.mxu1 %v1288_v3  ;;  %v704_v3 = vld [vmem:[#allocation8 + $0x2b0] sm:$0xff] }
 0x302   :  { %v490_v8 = vsel %vm451_vm1, %v488_v7, 0.0  ;;  %1186 = vmatprep.subr.mxu1 %v1568_v6 }
 0x303   :  { %491 = vadd.xlane.f32.xlu1 %v490_v8 }
 0x304   :  { %282 = vmatmul.mubr.f32.vlgmr.msra.gmra.mrb[0].mxu1 %v1659_v56 }
 0x305   :  { %1187 = vmatpush3.msra.mxu1 %v1668_v16  ;;  %1188 = vmatprep.mubr.msk.f32.mxu1 %vm1571_vm2, %v1568_v6 }
 0x306   :  { %1323 = vmatprep.subr.bf16.mxu1 %v1322_v17  ;;  %v716_v17 = vld [vmem:[#allocation8 + $0x3a0] sm:$0xff] }
 0x390   :  { %v492_v4 = vpop.xlane.xlu1 %491 }
 0x391   :  { %1436 = vrcp.f32 %v492_v4 }
 0x39b   :  { %v1437_v5 = vpop.eup %1436 }
 0x39c   :  { %v494_v7 = vmul.f32 %v1437_v5, %v492_v4  ;;  %v708_v4 = vld [vmem:[#allocation8 + $0x300] sm:$0xff] }
 0x39e   :  { %v495_v8 = vsub.f32 2.0, %v494_v7  ;;  %v1336_v7 = vpack.c.bf16 %v699_v61, %v695_v60 }
 0x3a0   :  { %v496_v9 = vmul.f32 %v1437_v5, %v495_v8  ;;  %v1364_v5 = vpack.c.bf16 %v693_v57, %v689_v55  ;;  %v697_v8 = vld [vmem:[#allocation8 + $0x218] sm:$0xff] }
 0x3a1   :  { %v731_v55 = vld [vmem:[#allocation8 + $0x4d8] sm:$0xff] }
 0x3a2   :  { %v505_v10 = vrot.slane %v496_v9, %v462_v53  ;;  %v501_v11 = vrot.slane %v496_v9, %v1678_v29  ;;  %v678_v53 = vld [vmem:[#allocation8 + $0x90] sm:$0xff]  ;;  %v701_v9 = vld [vmem:[#allocation8 + $0x268] sm:$0xff] }
 0x3a3   :  { %v1354_v19 = vpack.c.bf16 %v678_v53, %v674_v15  ;;  %v712_v15 = vld [vmem:[#allocation8 + $0x350] sm:$0xff]  ;;  %v1368_v53 = vpack.c.bf16 %v701_v9, %v697_v8 }
 0x3a4   :  { %v509_v12 = vmul.f32 %v1701_v63, %v505_v10  ;;  %v508_v16 = vmul.f32 %v1699_v62, %v501_v11  ;;  %v1324_v62 = vpack.c.bf16 %v675_v21, %v671_v20  ;;  %v1366_v10 = vpack.c.bf16 %v702_v2, %v698_v59  ;;  %v705_v20 = vld [vmem:[#allocation8 + $0x2b8] sm:$0xff]  ;;  %v709_v21 = vld [vmem:[#allocation8 + $0x308] sm:$0xff] }
 0x3a5   :  { %1355 = vmatprep.subr.bf16.mxu0 %v1354_v19  ;;  %v1338_v11 = vpack.c.bf16 %v708_v4, %v704_v3  ;;  %v1342_v24 = vpack.c.bf16 %v716_v17, %v712_v15  ;;  %v1372_v31 = vpack.c.bf16 %v709_v21, %v705_v20  ;;  %v733_v59 = vld [vmem:[#allocation8 + $0x4e8] sm:$0xff] }
 0x3a6   :  { %593 = vperm.xlu0 %1427, %v509_v12   ;;  %v706_v12 = vld [vmem:[#allocation8 + $0x2c0] sm:$0xff] }
 0x3a7   :  { %v1370_v22 = vpack.c.bf16 %v710_v14, %v706_v12 }
 0x3aa   :  { %512 = vperm.xlu0 %1427, %v508_v16   ;;  %v703_v16 = vld [vmem:[#allocation8 + $0x2a8] sm:$0xff] }
 0x3ab   :  { %v1340_v19 = vpack.c.bf16 %v707_v13, %v703_v16 }
 0x3d7   :  { %v1721_v29 = vpop.f32.mrb[0].mxu1 }
 0x3d8   :  { %v1723_v63 = vpop.f32.mrb[1].mxu1 }
 0x425   :  { %v594_v25 = vpop.permute.xlu0 %593 }
 0x426   :  { %v598_v28 = vrot.slane %v594_v25, %v1689_v46  ;;  %v714_v25 = vld [vmem:[#allocation8 + $0x360] sm:$0xff] }
 0x427   :  { %v1374_v34 = vpack.c.bf16 %v718_v27, %v714_v25 }
 0x428   :  { %1189 = vmatmul.mubr.msk.f32.vlgmr.msra.gmra.mrb[2].mxu1 %vm518_vm3, %v598_v28  ;;  %v720_v28 = vld [vmem:[#allocation8 + $0x3f0] sm:$0xff] }
 0x429   :  { %v513_v37 = vpop.permute.xlu0 %512  ;;  %1325 = vmatpush1.bf16.msra.mxu1 %v1324_v62  ;;  %804 = vmatprep.mubr.f32.mxu1 %v1568_v6  ;;  %v711_v62 = vld [vmem:[#allocation8 + $0x348] sm:$0xff] }
 0x42a   :  { %v517_v42 = vrot.slane %v513_v37, %v1689_v46  ;;  %1327 = vmatprep.subr.bf16.mxu1 %v1326_v30  ;;  %v1362_v46 = vpack.c.bf16 %v694_v49, %v690_v45  ;;  %v724_v30 = vld [vmem:[#allocation8 + $0x440] sm:$0xff]  ;;  %v1344_v32 = vpack.c.bf16 %v715_v26, %v711_v62  ;;  %v719_v37 = vld [vmem:[#allocation8 + $0x3e8] sm:$0xff] }
 0x42b   :  { %v1346_v36 = vpack.c.bf16 %v724_v30, %v720_v28  ;;  %v725_v45 = vld [vmem:[#allocation8 + $0x448] sm:$0xff]  ;;  %v732_v49 = vld [vmem:[#allocation8 + $0x4e0] sm:$0xff] }
 0x42c   :  { %1184 = vmatmul.mubr.msk.f32.vlgmr.msra.gmra.mrb[4].mxu0 %vm518_vm3, %v517_v42  ;;  %v1350_v51 = vpack.c.bf16 %v732_v49, %v728_v48 }
 0x42d   :  { %1357 = vmatpush1.bf16.msra.mxu0 %v1356_v38  ;;  %1329 = vmatpush1.bf16.msra.mxu1 %v1328_v39  ;;  %v723_v38 = vld [vmem:[#allocation8 + $0x438] sm:$0xff]  ;;  %v722_v39 = vld [vmem:[#allocation8 + $0x400] sm:$0xff] }
 0x42e   :  { %1359 = vmatprep.subr.bf16.mxu0 %v1358_v43  ;;  %1331 = vmatprep.subr.bf16.mxu1 %v1330_v44  ;;  %v1348_v42 = vpack.c.bf16 %v723_v38, %v719_v37  ;;  %v1378_v43 = vpack.c.bf16 %v726_v40, %v722_v39  ;;  %v721_v44 = vld [vmem:[#allocation8 + $0x3f8] sm:$0xff] }
 0x42f   :  { %875 = vmatprep.mubr.f32.mxu0 %v1568_v6  ;;  %v1380_v47 = vpack.c.bf16 %v725_v45, %v721_v44 }
 0x431   :  { %1361 = vmatpush1.bf16.msra.mxu0 %v1360_v52  ;;  %1333 = vmatpush1.bf16.msra.mxu1 %v1332_v54  ;;  %v734_v52 = vld [vmem:[#allocation8 + $0x4f0] sm:$0xff]  ;;  %v727_v54 = vld [vmem:[#allocation8 + $0x488] sm:$0xff] }
 0x432   :  { %1363 = vmatprep.subr.bf16.mxu0 %v1362_v46  ;;  %1335 = vmatprep.subr.bf16.mxu1 %v1334_v58  ;;  %v1382_v57 = vpack.c.bf16 %v734_v52, %v730_v50  ;;  %v1352_v46 = vpack.c.bf16 %v731_v55, %v727_v54  ;;  %v729_v58 = vld [vmem:[#allocation8 + $0x498] sm:$0xff] }
 0x433   :  { %v1384_v60 = vpack.c.bf16 %v733_v59, %v729_v58 }
 0x435   :  { %1365 = vmatpush1.bf16.msra.mxu0 %v1364_v5  ;;  %1337 = vmatpush1.bf16.msra.mxu1 %v1336_v7 }
 0x436   :  { %1367 = vmatprep.subr.bf16.mxu0 %v1366_v10  ;;  %1339 = vmatprep.subr.bf16.mxu1 %v1338_v11 }
 0x439   :  { %1369 = vmatpush1.bf16.msra.mxu0 %v1368_v53  ;;  %1341 = vmatpush1.bf16.msra.mxu1 %v1340_v19 }
 0x43a   :  { %1371 = vmatprep.subr.bf16.mxu0 %v1370_v22  ;;  %1343 = vmatprep.subr.bf16.mxu1 %v1342_v24 }
 0x43d   :  { %1373 = vmatpush1.bf16.msra.mxu0 %v1372_v31  ;;  %1345 = vmatpush1.bf16.msra.mxu1 %v1344_v32 }
 0x43e   :  { %1375 = vmatprep.subr.bf16.mxu0 %v1374_v34  ;;  %1347 = vmatprep.subr.bf16.mxu1 %v1346_v36 }
 0x441   :  { %1377 = vmatpush1.bf16.msra.mxu0 %v1376_v41  ;;  %1349 = vmatpush1.bf16.msra.mxu1 %v1348_v42 }
 0x442   :  { %1379 = vmatprep.subr.bf16.mxu0 %v1378_v43  ;;  %1351 = vmatprep.subr.bf16.mxu1 %v1350_v51 }
 0x445   :  { %1381 = vmatpush1.bf16.msra.mxu0 %v1380_v47  ;;  %1353 = vmatpush1.bf16.msra.mxu1 %v1352_v46 }
 0x446   :  { %1383 = vmatprep.subr.bf16.mxu0 %v1382_v57 }
 0x449   :  { %1385 = vmatpush1.bf16.msra.mxu0 %v1384_v60 }
 0x44a   :  { %1495 = shalt.err (!%p1492_p3)  }
 0x44b   :  { %s1496_s28 = scalar_lea.vmem %s1731_s13, 48  ;;  %s1500_s29 = scalar_lea.vmem %s1731_s13, 96 }
 0x44c   :  { %p1497_p4 = scmp.ne.s32.totalorder %s1731_s13, %s1496_s28  ;;  %p1501_p5 = scmp.lt.s32.totalorder %s1731_s13, %s1731_s13 }
 0x44d   :  { %p1502_p6 = scmp.lt.s32.totalorder %s1500_s29, %s1496_s28 }
 0x44f   :  { %p1503_p7 = por %p1502_p6, %p1501_p5 }
 0x451   :  { %p1504_p8 = pnand %p1503_p7, %p1497_p4 }
 0x453   :  { %1507 = shalt.err (!%p1504_p8)  }
 0x454   :  { %s1573_s30 = smov 128   ;;  %s1574_s2 = smov 32  }
 0x455   :  { %s1575_s8 = smov 1   ;;  %s1095_s1 = sld [smem:[#allocation4 + $0x1]] }
 0x456   :  { %60 = dma.hbm_to_vmem [thread:$0]  %s55_s0, 48, %s1731_s13, [#allocation3], %s1573_s30, %s1574_s2, %s1575_s8 }
 0x457   :  { %s1576_s14 = smov [#allocation2 + $0x1]  }
 0x458   :  { %s71_s15 = sshll.u32 %s1576_s14, 4  ;;  %s72_s15 = int_to_ptr.vmem [resolvable:$true] %s71_s15 }
 0x45b   :  { %s62_s9 = sshrl.u32 %s1095_s1, 3  ;;  %s63_s11 = sand.u32 7, %s1095_s1  }
 0x45c   :  { %s64_s10 = smul.u32 24, %s62_s9 }
 0x45e   :  { %s65_s5 = sadd.s32 %s64_s10, %s63_s11 }
 0x45f   :  { %s1096_s12 = sshll.u32 %s65_s5, 4 }
 0x460   :  { %s67_s18 = scalar_lea.hbm %s1804_s3, %s1096_s12 }
 0x461   :  { %s1508_s19 = scalar_lea.hbm %s67_s18, 48  ;;  %p1511_p10 = scmp.lt.u32.totalorder %s67_s18, %s1804_s3 }
 0x462   :  { %p1509_p9 = scmp.ne.s32.totalorder %s67_s18, %s1508_s19  ;;  %p1512_p11 = scmp.lt.u32.totalorder %s1486_s24, %s1508_s19 }
 0x463   :  { %p1514_p13 = scmp.lt.u32.totalorder %s1508_s19, %s67_s18 }
 0x464   :  { %p1513_p12 = por %p1512_p11, %p1511_p10 }
 0x466   :  { %p1515_p0 = por %p1514_p13, %p1513_p12 }
 0x468   :  { %p1516_p1 = pnand %p1515_p0, %p1509_p9 }
 0x4fb   :  { %v667_v61 = vpop.f32.mrb[2].mxu1 }
 0x4fc   :  { %v1190_v2 = vpop.f32.mrb[3].mxu1  ;;  %v737_v3 = vrot.slane %v667_v61, 7 }
 0x4ff   :  { %v587_v4 = vpop.f32.mrb[4].mxu0 }
 0x500   :  { %v738_v5 = vsel %vm448_vm0, %v737_v3, %v587_v4  ;;  %v1185_v7 = vpop.f32.mrb[5].mxu0 }
 0x501   :  { %805 = vmatmul.mubr.f32.vlgmr.msra.gmra.mrb[4].mxu1 %v738_v5  ;;  %876 = vmatmul.mubr.f32.vlgmr.msra.gmra.mrb[6].mxu0 %v738_v5 }
 0x502   :  { %1519 = shalt.err (!%p1516_p1)  }
 0x503   :  { %s1520_s23 = scalar_lea.vmem %s72_s15, 48  ;;  %p1525_p3 = scmp.lt.s32.totalorder %s72_s15, %s1731_s13 }
 0x504   :  { %p1521_p2 = scmp.ne.s32.totalorder %s72_s15, %s1520_s23  ;;  %p1526_p4 = scmp.lt.s32.totalorder %s1500_s29, %s1520_s23 }
 0x506   :  { %p1527_p5 = por %p1526_p4, %p1525_p3 }
 0x508   :  { %p1528_p6 = pnand %p1527_p5, %p1521_p2 }
 0x50a   :  { %1531 = shalt.err (!%p1528_p6)  }
 0x50b   :  { %74 = dma.hbm_to_vmem [thread:$0]  %s67_s18, 48, %s72_s15, [#allocation3 + $0x1], %s1573_s30, %s1574_s2, %s1575_s8 }
 0x5d4   :  { %v806_v8 = vpop.f32.mrb[4].mxu1  ;;  %v877_v9 = vpop.f32.mrb[6].mxu0 }
 0x5d5   :  { %v808_v10 = vpop.f32.mrb[5].mxu1  ;;  %v1774_v11 = vpop.f32.mrb[7].mxu0 }
 0x5d6   :  { %1558 = dma.done.wait [#allocation3], 48 }
 0x5d7   :  { %1559 = vsyncadd [#allocation3], 4294967248 }
 0x5d8   :  { %1560 = dma.done.wait [#allocation3 + $0x1], 48 }
 0x5d9   :  { %1561 = vsyncadd [#allocation3 + $0x1], 4294967248  ;;  %1223 = vmatprep.mubr.msk.f32.mxu1 %vm1571_vm2, %v1568_v6  ;;  %v1577_v12 = vmov 0.0|0.0   ;;  %v1578_v16 = vmov 1983009808   ;;  %v893_v14 = vcombine.low %v806_v8, %v808_v10  ;;  %v944_v53 = vld [vmem:[#allocation8 + $0x48] sm:$0xff]  ;;  %v934_v55 = vadd.f32 %v1647_v0, %v1723_v63 }
 0x5da   :  { %1386 = vmatprep.subr.bf16.mxu1 %v1577_v12  ;;  %v895_v13 = vunpack.c.l.s4 %v1578_v16  ;;  %v945_v19 = vld [vmem:[#allocation8 + $0x98] sm:$0xff]  ;;  %v946_v20 = vld [vmem:[#allocation8 + $0xe8] sm:$0xff]  ;;  %vm1037_vm4 = vcmask 1041408  }
 0x5db   :  { %v1387_v24 = vpack.c.bf16 %v945_v19, %v944_v53  ;;  %v947_v25 = vld [vmem:[#allocation8 + $0x138] sm:$0xff]  ;;  %v948_v6 = vld [vmem:[#allocation8 + $0x188] sm:$0xff] }
 0x5dc   :  { %v896_v15 = vunpack.c.0.s8 %v895_v13  ;;  %v1390_v26 = vpack.c.bf16 %v947_v25, %v946_v20  ;;  %v949_v27 = vld [vmem:[#allocation8 + $0x1d8] sm:$0xff]  ;;  %v950_v32 = vld [vmem:[#allocation8 + $0x228] sm:$0xff] }
 0x5dd   :  { %1388 = vmatpush3.bf16.msra.mxu1 %v1387_v24  ;;  %v889_v28 = vld [vmem:[#allocation2] sm:$0x3f]  ;;  %v1393_v31 = vpack.c.bf16 %v949_v27, %v948_v6  ;;  %v952_v38 = vld [vmem:[#allocation8 + $0x2c8] sm:$0xff] }
 0x5de   :  { %v899_v17 = vsub.s32 %v896_v15, %v1674_v23  ;;  %1389 = vmatprep.subr.bf16.mxu1 %v1577_v12  ;;  %v951_v23 = vld [vmem:[#allocation8 + $0x278] sm:$0xff]  ;;  %v954_v42 = vld [vmem:[#allocation8 + $0x368] sm:$0xff] }
 0x5df   :  { %v1396_v37 = vpack.c.bf16 %v951_v23, %v950_v32  ;;  %v953_v39 = vld [vmem:[#allocation8 + $0x318] sm:$0xff]  ;;  %v958_v49 = vld [vmem:[#allocation8 + $0x4a8] sm:$0xff] }
 0x5e0   :  { %v900_v21 = vrot.slane %v893_v14, %v899_v17  ;;  %v907_v22 = vrot.slane %v877_v9, %v899_v17  ;;  %v1399_v41 = vpack.c.bf16 %v953_v39, %v952_v38  ;;  %v955_v43 = vld [vmem:[#allocation8 + $0x3b8] sm:$0xff] }
 0x5e1   :  { %1391 = vmatpush3.bf16.msra.mxu1 %v1390_v26  ;;  %v1402_v44 = vpack.c.bf16 %v955_v43, %v954_v42  ;;  %v957_v45 = vld [vmem:[#allocation8 + $0x458] sm:$0xff] }
 0x5e2   :  { %v908_v62 = vcombine.low %v900_v21, %v907_v22  ;;  %1392 = vmatprep.subr.bf16.mxu1 %v1577_v12  ;;  %v959_v50 = vld [vmem:[#allocation8 + $0x4f8] sm:$0xff] }
 0x5e3   :  { %v1408_v52 = vpack.c.bf16 %v959_v50, %v958_v49 }
 0x5e4   :  { %v910_v30 = vadd.f32 %v908_v62, %v889_v28 }
 0x5e5   :  { %1394 = vmatpush3.bf16.msra.mxu1 %v1393_v31 }
 0x5e6   :  { %v911_v33 = vadd.f32 %v910_v30, %v1672_v18  ;;  %v919_v34 = vrot.slane %v910_v30, 2  ;;  %1395 = vmatprep.subr.bf16.mxu1 %v1577_v12  ;;  %v956_v18 = vld [vmem:[#allocation8 + $0x408] sm:$0xff]  ;;  %v936_v57 = vrot.slane %v910_v30, 4 }
 0x5e8   :  { %v1101_v35 = vmul.f32 -1.442695, %v911_v33  ;;  %v921_v36 = vadd.f32 %v919_v34, %v1721_v29  ;;  %v1405_v29 = vpack.c.bf16 %v957_v45, %v956_v18 }
 0x5e9   :  { %1397 = vmatpush3.bf16.msra.mxu1 %v1396_v37 }
 0x5ea   :  { %1438 = vpow2.f32 %v1101_v35  ;;  %v1102_v40 = vmul.f32 -1.442695, %v921_v36  ;;  %1398 = vmatprep.subr.bf16.mxu1 %v1577_v12 }
 0x5ec   :  { %1440 = vpow2.f32 %v1102_v40 }
 0x5ed   :  { %1400 = vmatpush3.bf16.msra.mxu1 %v1399_v41 }
 0x5ee   :  { %1401 = vmatprep.subr.bf16.mxu1 %v1577_v12 }
 0x5f1   :  { %1403 = vmatpush3.bf16.msra.mxu1 %v1402_v44 }
 0x5f2   :  { %1404 = vmatprep.subr.bf16.mxu1 %v1577_v12 }
 0x5f4   :  { %v1439_v47 = vpop.eup %1438 }
 0x5f5   :  { %v915_v48 = vadd.f32 1.0, %v1439_v47  ;;  %1406 = vmatpush3.bf16.msra.mxu1 %v1405_v29 }
 0x5f6   :  { %v1441_v51 = vpop.eup %1440  ;;  %1407 = vmatprep.subr.bf16.mxu1 %v1577_v12 }
 0x5f7   :  { %1442 = vrcp.f32 %v915_v48  ;;  %v925_v54 = vadd.f32 1.0, %v1441_v51 }
 0x5f9   :  { %1409 = vmatpush3.bf16.msra.mxu1 %v1408_v52  ;;  %1444 = vrcp.f32 %v925_v54 }
 0x601   :  { %v1443_v46 = vpop.eup %1442 }
 0x602   :  { %v935_v58 = vmul.f32 %v1443_v46, %v934_v55 }
 0x603   :  { %v1445_v60 = vpop.eup %1444 }
 0x604   :  { %v938_v59 = vadd.f32 %v936_v57, %v935_v58  ;;  %v940_v61 = vsub.f32 1.0, %v1445_v60  ;;  %v942_v2 = vmul.f32 %v1445_v60, %v1659_v56 }
 0x606   :  { %1446 = vtanh.f32 %v938_v59 }
 0x610   :  { %v1447_v3 = vpop.eup %1446 }
 0x611   :  { %v941_v4 = vmul.f32 %v1447_v3, %v940_v61 }
 0x613   :  { %v943_v5 = vadd.f32 %v942_v2, %v941_v4 }
 0x615   :  { %1224 = vmatmul.mubr.f32.vlgmr.msra.gmra.mrb[6].mxu1 %v943_v5  ;;  %1052 = vst [vmem:[%s1808_s7] sm:$0x3] %v943_v5  ;;  %s1579_s7 = smov [#allocation9]  }
 0x616   :  { %s1059_s24 = sshll.u32 %s1579_s7, 4  ;;  %s1060_s24 = int_to_ptr.vmem [resolvable:$true] %s1059_s24 }
 0x617   :  { %s1532_s25 = scalar_lea.vmem %s1060_s24, 32  ;;  %p1537_p8 = scmp.lt.s32.totalorder %s1060_s24, %s1060_s24 }
 0x618   :  { %p1533_p7 = scmp.ne.s32.totalorder %s1060_s24, %s1532_s25  ;;  %p1538_p9 = scmp.lt.s32.totalorder %s1532_s25, %s1532_s25 }
 0x61a   :  { %p1539_p10 = por %p1538_p9, %p1537_p8 }
 0x61c   :  { %p1540_p11 = pnand %p1539_p10, %p1533_p7 }
 0x6e8   :  { %v1026_v7 = vpop.f32.mrb[6].mxu1 }
 0x6e9   :  { %v1027_v0 = vadd.f32 %v1026_v7, %v1774_v11  ;;  %v1225_v63 = vpop.f32.mrb[7].mxu1 }
 0x6eb   :  { %v1036_v8 = vadd.f32 %v1652_v1, %v1027_v0 }
 0x6ed   :  { %v1038_v9 = vsel %vm1037_vm4, %v1036_v8, -inf }
 0x6ee   :  { %1039 = vmax.xlane.f32.xlu0 %v1038_v9 }
 0x77b   :  { %v1040_v10 = vpop.xlane.xlu0 %1039 }
 0x77c   :  { %v1041_v12 = vsub.f32 %v1036_v8, %v1040_v10 }
 0x77e   :  { %v1042_v56 = vmul.f32 1.442695, %v1041_v12 }
 0x780   :  { %1448 = vpow2.f32 %v1042_v56 }
 0x78a   :  { %v1449_v16 = vpop.eup %1448 }
 0x78b   :  { %v1044_v13 = vsel %vm1037_vm4, %v1449_v16, 0.0 }
 0x78c   :  { %1045 = vadd.xlane.f32.xlu0 %v1044_v13 }
 0x819   :  { %v1046_v14 = vpop.xlane.xlu0 %1045 }
 0x81a   :  { %1450 = vlog2.f32 %v1046_v14 }
 0x824   :  { %v1451_v15 = vpop.eup %1450 }
 0x825   :  { %v1048_v17 = vmul.f32 0.6931472, %v1451_v15 }
 0x827   :  { %v1049_v11 = vadd.f32 %v1048_v17, %v1040_v10 }
 0x829   :  { %v1050_v53 = vsub.f32 %v1036_v8, %v1049_v11 }
 0x82b   :  { %1051 = vst [vmem:[#allocation9] sm:$0x3] %v1050_v53 }
 0x82c   :  { %1543 = shalt.err (!%p1540_p11)
}
 0x82d   :  { %s1544_s4 = scalar_lea.hbm %s1807_s6, 32 }
 0x82e   :  { %p1545_p12 = scmp.ne.s32.totalorder %s1807_s6, %s1544_s4  ;;  %p1548_p13 = scmp.lt.u32.totalorder %s1544_s4, %s1807_s6 }
 0x830   :  { %p1550_p0 = pnand %p1548_p13, %p1545_p12 }
 0x832   :  { %1553 = shalt.err (!%p1550_p0)
}
 0x833   :  { %1062 = dma.vmem_to_hbm [thread:$0]  %s1060_s24, 32, %s1807_s6, [#allocation6]  }
 0x834   :  { %1562 = dma.done.wait [#allocation6], 32  }
 0x835   :  { %1563 = vsyncadd [#allocation6], 4294967264 }
 0x836   :  { %1070 = vsyncpa [#allocation5], 1 }
 0x837   :  { %1071 = vsyncpa [#allocation6], 1 }
 0x838   :  { %1072 = vsyncpa [#allocation7], 1 }
 0x839   :  { %1073 = vsyncmov [#allocation3] }
 0x83c   :  { %s1074_s9 = vpop.sfrf %1073 }
 0x83d   :  { %p1105_p1 = scmp.ne.s32.totalorder %s1074_s9, 0 }
 0x83f   :  { %1078 = shalt.err (%p1105_p1)  }
 0x840   :  { %1080 = vsyncmov [#allocation3 + $0x1] }
 0x843   :  { %s1081_s10 = vpop.sfrf %1080 }
 0x844   :  { %p1106_p2 = scmp.ne.s32.totalorder %s1081_s10, 0 }
 0x846   :  { %1085 = shalt.err (%p1106_p2)  }

</bundles_post_ra>
